<compile_context>
chip_gen: v7x
topology: tpu7x:2x2x1
jax: 0.10.0
libtpu: 0.0.40
codegen_flags: <defaults>
</compile_context>

<pallas_src>
import math

import jax
import jax.numpy as jnp
from jax.experimental import pallas as pl
from jax.experimental.pallas import tpu as pltpu


def _fused_heads_kernel(x_ref, w_ref, b_ref, o_ref):
    # x_ref: (B, D)      -- f32 activations (tiny, cast to MXU dtype in-register)
    # w_ref: (D, TN)     -- bf16 fused weights (all heads concatenated on N)
    # b_ref: (1, TN)     -- f32 fused bias
    # o_ref: (B, TN)     -- f32 output slab (lane-dense, TN multiple of 128)
    x = x_ref[...].astype(w_ref.dtype)
    acc = jnp.dot(x, w_ref[...], preferred_element_type=jnp.float32)
    o_ref[...] = (acc + b_ref[...]).astype(o_ref.dtype)


def _pick_tile_n(d, n, itemsize, budget_bytes=8 << 20):
    """Largest tile of the fused N axis (multiple of 128, dividing n) whose
    double-buffered weight block stays within `budget_bytes`. Falls back to
    the full axis when n is not 128-aligned (full-extent blocks are legal)."""
    if n % 128 != 0:
        return n
    if 2 * d * n * itemsize <= budget_bytes:
        return n
    tn = n - 128
    while tn >= 128:
        if n % tn == 0 and tn % 128 == 0 and 2 * d * tn * itemsize <= budget_bytes:
            return tn
        tn -= 128
    return 128


def multi_classify(x, w_all, b_all, class_num):
    """x: [B, D], w_all: [D, H*C] (bf16), b_all: [1, H*C] (f32) -> tuple of H [B, C]."""
    B, D = x.shape
    Dw, N = w_all.shape
    assert Dw == D and N % class_num == 0
    H = N // class_num

    tn = _pick_tile_n(D, N, jnp.dtype(w_all.dtype).itemsize)
    grid_n = N // tn

    out_itemsize = jnp.dtype(x.dtype).itemsize
    cost = pl.CostEstimate(
        flops=2 * B * D * N,
        transcendentals=0,
        bytes_accessed=(x.size * jnp.dtype(x.dtype).itemsize
                        + w_all.size * jnp.dtype(w_all.dtype).itemsize
                        + b_all.size * jnp.dtype(b_all.dtype).itemsize
                        + B * N * out_itemsize),
    )

    out = pl.pallas_call(
        _fused_heads_kernel,
        out_shape=jax.ShapeDtypeStruct((B, N), x.dtype),
        grid_spec=pltpu.PrefetchScalarGridSpec(
            num_scalar_prefetch=0,
            grid=(grid_n,),
            in_specs=[
                pl.BlockSpec((B, D), lambda j: (0, 0)),    # x reused across N tiles
                pl.BlockSpec((D, tn), lambda j: (0, j)),   # fused weights, N-tiled
                pl.BlockSpec((1, tn), lambda j: (0, j)),   # fused bias, N-tiled
            ],
            out_specs=pl.BlockSpec((B, tn), lambda j: (0, j)),
        ),
        compiler_params=pltpu.CompilerParams(
            dimension_semantics=("parallel",)),
        cost_estimate=cost,
    )(x, w_all, b_all)

    # Static, contiguous column slices recover the 5-tuple of per-head logits.
    return tuple(out[:, h * class_num:(h + 1) * class_num] for h in range(H))


def init_params(key, bottleneck_dim, class_num, param_dtype=jnp.bfloat16):
    """Re-implementation of the PyTorch __init__ weight inits, fused for the kernel.

    PyTorch Linear weight shape is (class_num, bottleneck_dim); fan_in = D,
    fan_out = C. Weights are stored transposed (D, C), then concatenated along
    the output axis into W_all[D, 5*C] (cast to `param_dtype`); biases into
    b_all[1, 5*C] (kept f32).
    """
    D, C = bottleneck_dim, class_num
    keys = jax.random.split(key, 10)

    def u(k, shape, bound):
        return jax.random.uniform(k, shape, jnp.float32, minval=-bound, maxval=bound)

    def n(k, shape, std):
        return jax.random.normal(k, shape, jnp.float32) * std

    gain_relu = math.sqrt(2.0)

    # fc1: xavier_uniform_, gain = calculate_gain('relu') = sqrt(2)
    w1 = u(keys[0], (D, C), gain_relu * math.sqrt(6.0 / (D + C)))
    # fc2: xavier_normal_, gain = 1
    w2 = n(keys[1], (D, C), math.sqrt(2.0 / (D + C)))
    # fc3: kaiming_uniform_ (defaults: a=0, leaky_relu) -> gain = sqrt(2)
    w3 = u(keys[2], (D, C), gain_relu * math.sqrt(3.0 / D))
    # fc4: kaiming_uniform_(nonlinearity='relu') -> gain = sqrt(2)
    w4 = u(keys[3], (D, C), gain_relu * math.sqrt(3.0 / D))
    # fc5: kaiming_normal_(a=sqrt(5)) -> gain = sqrt(2 / (1 + 5)) = sqrt(1/3)
    w5 = n(keys[4], (D, C), math.sqrt(1.0 / 3.0) / math.sqrt(D))

    # Biases keep PyTorch Linear default: U(-1/sqrt(fan_in), 1/sqrt(fan_in))
    b_bound = 1.0 / math.sqrt(D)
    biases = [u(keys[5 + i], (1, C), b_bound) for i in range(5)]

    w_stack = jnp.stack([w1, w2, w3, w4, w5], axis=0)                 # (5, D, C)
    w_all = jnp.transpose(w_stack, (1, 0, 2)).reshape(D, 5 * C)       # (D, 5C)
    b_all = jnp.concatenate(biases, axis=1)                           # (1, 5C)
    return w_all.astype(param_dtype), b_all.astype(jnp.float32)


if __name__ == "__main__":
    # Small, TPU-tile-friendly shapes consistent with the module's interface.
    batch = 8
    bottleneck_dim = 128
    class_num = 256
    num_heads = 5

    key = jax.random.PRNGKey(0)
    k_x, k_p = jax.random.split(key)
    x = jax.random.normal(k_x, (batch, bottleneck_dim), jnp.float32)
    w_all, b_all = init_params(k_p, bottleneck_dim, class_num)

    outs = multi_classify(x, w_all, b_all, class_num)
    outs = jax.block_until_ready(outs)

    # Reference: same bf16 weight/activation quantization, f32 accumulate.
    x_q = x.astype(w_all.dtype).astype(jnp.float32)
    w_f32 = w_all.astype(jnp.float32)
    ref_full = x_q @ w_f32 + b_all

    assert len(outs) == num_heads
    for h, y in enumerate(outs):
        ref = ref_full[:, h * class_num:(h + 1) * class_num]
        assert y.shape == (batch, class_num)
        assert y.dtype == x.dtype
        assert jnp.allclose(y, ref, atol=5e-3, rtol=5e-3), f"head {h} mismatch"

    print("KERNEL_OK")
</pallas_src>

<mosaic_0001>
module attributes {stable_mosaic.version = 11 : i64} {
  func.func @_fused_heads_kernel(%arg0: i32, %arg1: memref<8x128xf32, #tpu.memory_space<vmem>>, %arg2: memref<128x1280xbf16, #tpu.memory_space<vmem>>, %arg3: memref<1x1280xf32, #tpu.memory_space<vmem>>, %arg4: memref<8x1280xf32, #tpu.memory_space<vmem>>) attributes {dimension_semantics = [#tpu.dimension_semantics<parallel>], iteration_bounds = array<i64: 1>, scalar_prefetch = 0 : i64, scratch_operands = 0 : i64, tpu.core_type = #tpu.core_type<tc>, window_params = [{pipeline_mode = #tpu.pipeline_mode<synchronous>, transform_indices = @transform_0, window_bounds = array<i64: 8, 128>}, {transform_indices = @transform_1, window_bounds = array<i64: 128, 1280>}, {transform_indices = @transform_2, window_bounds = array<i64: 1, 1280>}, {transform_indices = @transform_3, window_bounds = array<i64: 8, 1280>}]} {
    %c0 = arith.constant 0 : index
    %c0_0 = arith.constant 0 : index
    %0 = vector.load %arg1[%c0, %c0_0] : memref<8x128xf32, #tpu.memory_space<vmem>>, vector<8x128xf32>
    %1 = arith.truncf %0 : vector<8x128xf32> to vector<8x128xbf16>
    %c0_1 = arith.constant 0 : index
    %c0_2 = arith.constant 0 : index
    %2 = vector.load %arg2[%c0_1, %c0_2] : memref<128x1280xbf16, #tpu.memory_space<vmem>>, vector<128x1280xbf16>
    %cst = arith.constant dense<0.000000e+00> : vector<8x1280xf32>
    %3 = tpu.matmul %1, %2, %cst {dimension_numbers = #tpu.dot_dimension_numbers<[1], [0], [0], [1], [0, 0, 1, 1], [], []>} : vector<8x128xbf16>, vector<128x1280xbf16>, vector<8x1280xf32> -> vector<8x1280xf32>
    %c0_3 = arith.constant 0 : index
    %c0_4 = arith.constant 0 : index
    %4 = vector.load %arg3[%c0_3, %c0_4] : memref<1x1280xf32, #tpu.memory_space<vmem>>, vector<1x1280xf32>
    %5 = vector.broadcast %4 : vector<1x1280xf32> to vector<8x1280xf32>
    %6 = arith.addf %3, %5 : vector<8x1280xf32>
    %c0_5 = arith.constant 0 : index
    %c0_6 = arith.constant 0 : index
    %7 = vector.load %arg4[%c0_5, %c0_6] : memref<8x1280xf32, #tpu.memory_space<vmem>>, vector<8x1280xf32>
    tpu.vector_store %arg4[%c0_5, %c0_6], %6 {strides = array<i32>} : memref<8x1280xf32, #tpu.memory_space<vmem>>, vector<8x1280xf32>,
    return
  }
  func.func @transform_0(%arg0: i32) -> (i32, i32) {
    %c0_i32 = arith.constant 0 : i32
    %c0_i32_0 = arith.constant 0 : i32
    %c0_i32_1 = arith.constant 0 : i32
    return %c0_i32, %c0_i32_0 : i32, i32
  }
  func.func @transform_1(%arg0: i32) -> (i32, i32) {
    %c0_i32 = arith.constant 0 : i32
    %c0_i32_0 = arith.constant 0 : i32
    return %c0_i32, %arg0 : i32, i32
  }
  func.func @transform_2(%arg0: i32) -> (i32, i32) {
    %c0_i32 = arith.constant 0 : i32
    %c0_i32_0 = arith.constant 0 : i32
    return %c0_i32, %arg0 : i32, i32
  }
  func.func @transform_3(%arg0: i32) -> (i32, i32) {
    %c0_i32 = arith.constant 0 : i32
    %c0_i32_0 = arith.constant 0 : i32
    return %c0_i32, %arg0 : i32, i32
  }
}

</mosaic_0001>

<bundles_post_ra>
// kernel: tpu_custom_call.1
= control target key start
LH: loop header
LB: loop body
LE: loop exit
PB: predicated region body
PF: predicated region fallthrough
CT: control target
= control target key end

     0   :  { %8 = vsyncpa [#allocation3], 0  ;;  %s1208_s0 = inlined_call_operand.hbm [shape: f32[8,128], index: 0, kind: input, shape index: {}]   ;;  %s1209_s1 = inlined_call_operand.hbm [shape: bf16[128,1280], index: 1, kind: input, shape index: {}]   ;;  %s1210_s2 = inlined_call_operand.hbm [shape: f32[1,1280], index: 2, kind: input, shape index: {}]   ;;  %s1211_s3 = inlined_call_operand.hbm [shape: f32[8,1280], index: 3, kind: output, shape index: {}]  }
   0x1   :  { %9 = vsyncpa [#allocation6], 0 }
   0x2   :  { %10 = vsyncpa [#allocation4], 0  ;;  %s1121_s12 = smov [#allocation5]   ;;  %s1027_s16 = scalar_lea.hbm %s1209_s1, 10240 }
   0x3   :  { %s26_s13 = sshll.u32 %s1121_s12, 4  ;;  %p1028_p0 = scmp.ne.s32.totalorder %s1209_s1, %s1027_s16  ;;  %s27_s13 = int_to_ptr.vmem [resolvable:$true] %s26_s13 }
   0x4   :  { %p1031_p1 = scmp.lt.u32.totalorder %s1027_s16, %s1209_s1 }
   0x6   :  { %p1033_p2 = pnand %p1031_p1, %p1028_p0 }
   0x8   :  { %1036 = shalt.err (!%p1033_p2)
}
   0x9   :  { %s1037_s21 = scalar_lea.vmem %s27_s13, 10240  ;;  %p1042_p4 = scmp.lt.s32.totalorder %s27_s13, %s27_s13 }
   0xa   :  { %p1038_p3 = scmp.ne.s32.totalorder %s27_s13, %s1037_s21  ;;  %p1043_p5 = scmp.lt.s32.totalorder %s1037_s21, %s1037_s21 }
   0xc   :  { %p1044_p6 = por %p1043_p5, %p1042_p4 }
   0xe   :  { %p1045_p7 = pnand %p1044_p6, %p1038_p3 }
  0x10   :  { %1048 = shalt.err (!%p1045_p7)
}
  0x11   :  { %s1122_s22 = smov 640   ;;  %s1123_s23 = smov 40  }
  0x12   :  { %32 = dma.hbm_to_vmem [thread:$0]  %s1209_s1, 10240, %s27_s13, [#allocation6], %s1122_s22, %s1122_s22, %s1123_s23  }
  0x13   :  { %s1124_s26 = smov [#allocation2]   ;;  %s1125_s28 = smov [#allocation7]  }
  0x14   :  { %s17_s27 = sshll.u32 %s1124_s26, 4  ;;  %s39_s29 = sshll.u32 %s1125_s28, 4  ;;  %s18_s27 = int_to_ptr.vmem [resolvable:$true] %s17_s27  ;;  %s40_s29 = int_to_ptr.vmem [resolvable:$true] %s39_s29 }
  0x15   :  { %s1049_s5 = scalar_lea.hbm %s1208_s0, 128 }
  0x16   :  { %p1050_p8 = scmp.ne.s32.totalorder %s1208_s0, %s1049_s5  ;;  %p1053_p9 = scmp.lt.u32.totalorder %s1049_s5, %s1208_s0 }
  0x18   :  { %p1055_p10 = pnand %p1053_p9, %p1050_p8 }
  0x1a   :  { %1058 = shalt.err (!%p1055_p10)
}
  0x1b   :  { %s1059_s1 = scalar_lea.vmem %s18_s27, 128  ;;  %p1064_p12 = scmp.lt.s32.totalorder %s18_s27, %s18_s27 }
  0x1c   :  { %p1060_p11 = scmp.ne.s32.totalorder %s18_s27, %s1059_s1  ;;  %p1065_p13 = scmp.lt.s32.totalorder %s1059_s1, %s1059_s1 }
  0x1e   :  { %p1066_p0 = por %p1065_p13, %p1064_p12 }
  0x20   :  { %p1067_p1 = pnand %p1066_p0, %p1060_p11 }
  0x22   :  { %1070 = shalt.err (!%p1067_p1)
}
  0x23   :  { %20 = dma.hbm_to_vmem [thread:$0]  %s1208_s0, 128, %s18_s27, [#allocation3]  }
  0x24   :  { %s1071_s14 = scalar_lea.hbm %s1210_s2, 160 }
  0x25   :  { %p1072_p2 = scmp.ne.s32.totalorder %s1210_s2, %s1071_s14  ;;  %p1075_p3 = scmp.lt.u32.totalorder %s1071_s14, %s1210_s2 }
  0x27   :  { %p1077_p4 = pnand %p1075_p3, %p1072_p2 }
  0x29   :  { %1080 = shalt.err (!%p1077_p4)
}
  0x2a   :  { %s1081_s19 = scalar_lea.vmem %s40_s29, 160  ;;  %p1086_p6 = scmp.lt.s32.totalorder %s40_s29, %s40_s29 }
  0x2b   :  { %p1082_p5 = scmp.ne.s32.totalorder %s40_s29, %s1081_s19  ;;  %p1087_p7 = scmp.lt.s32.totalorder %s1081_s19, %s1081_s19 }
  0x2d   :  { %p1088_p8 = por %p1087_p7, %p1086_p6 }
  0x2f   :  { %p1089_p9 = pnand %p1088_p8, %p1082_p5 }
  0x31   :  { %1092 = shalt.err (!%p1089_p9)
}
  0x32   :  { %42 = dma.hbm_to_vmem [thread:$0]  %s1210_s2, 160, %s40_s29, [#allocation6]  }
  0x33   :  { %1115 = dma.done.wait [#allocation3], 128  }
  0x34   :  { %1116 = vsyncadd [#allocation3], 4294967168 }
  0x35   :  { %1117 = dma.done.wait [#allocation6], 10400  }
  0x36   :  { %1118 = vsyncadd [#allocation6], 4294956896  ;;  %v1126_v0 = vmov 0   ;;  %v907_v1 = vld [vmem:[#allocation5 + $0x4] ss:$40 sps:$4 sm:$0xff]   ;;  %v53_v26 = vld [vmem:[#allocation2] sm:$0xff] }
  0x37   :  { %621 = vmatprep.mubr.bf16.mxu0 %v1126_v0  ;;  %662 = vmatprep.mubr.bf16.mxu1 %v1126_v0  ;;  %v909_v2 = vld [vmem:[#allocation5] ss:$40 sps:$4 sm:$0xff]   ;;  %v910_v3 = vld [vmem:[#allocation5 + $0x54] ss:$40 sps:$4 sm:$0xff]   ;;  %v912_v4 = vld [vmem:[#allocation5 + $0x50] ss:$40 sps:$4 sm:$0xff]   ;;  %v1186_v30 = vpack.c.bf16 %v53_v26, %v53_v26 }
  0x38   :  { %589 = vmatprep.subr.bf16.mxu0 %v907_v1  ;;  %v913_v5 = vld [vmem:[#allocation5 + $0xa4] ss:$40 sps:$4 sm:$0xff]   ;;  %v915_v6 = vld [vmem:[#allocation5 + $0xa0] ss:$40 sps:$4 sm:$0xff]   ;;  %v916_v7 = vld [vmem:[#allocation5 + $0xf4] ss:$40 sps:$4 sm:$0xff]  }
  0x39   :  { %590 = vmatpush1.bf16.msra.mxu0 %v909_v2  ;;  %v918_v8 = vld [vmem:[#allocation5 + $0xf0] ss:$40 sps:$4 sm:$0xff]   ;;  %v931_v9 = vld [vmem:[#allocation5 + $0xc] ss:$40 sps:$4 sm:$0xff]   ;;  %v937_v12 = vld [vmem:[#allocation5 + $0x5c] ss:$40 sps:$4 sm:$0xff]  }
  0x3a   :  { %591 = vmatprep.subr.bf16.mxu0 %v910_v3  ;;  %v933_v10 = vld [vmem:[#allocation5 + $0x8] ss:$40 sps:$4 sm:$0xff]   ;;  %v919_v11 = vld [vmem:[#allocation5 + $0x144] ss:$40 sps:$4 sm:$0xff]   ;;  %630 = vmatprep.subr.bf16.mxu1 %v931_v9  ;;  %v939_v13 = vld [vmem:[#allocation5 + $0x58] ss:$40 sps:$4 sm:$0xff]  }
  0x3b   :  { %631 = vmatpush1.bf16.msra.mxu1 %v933_v10  ;;  %v921_v14 = vld [vmem:[#allocation5 + $0x140] ss:$40 sps:$4 sm:$0xff]   ;;  %v922_v15 = vld [vmem:[#allocation5 + $0x194] ss:$40 sps:$4 sm:$0xff]   ;;  %v924_v17 = vld [vmem:[#allocation5 + $0x190] ss:$40 sps:$4 sm:$0xff]  }
  0x3c   :  { %632 = vmatprep.subr.bf16.mxu1 %v937_v12  ;;  %v943_v16 = vld [vmem:[#allocation5 + $0xac] ss:$40 sps:$4 sm:$0xff]   ;;  %v945_v18 = vld [vmem:[#allocation5 + $0xa8] ss:$40 sps:$4 sm:$0xff]   ;;  %v949_v19 = vld [vmem:[#allocation5 + $0xfc] ss:$40 sps:$4 sm:$0xff]  }
  0x3d   :  { %592 = vmatpush1.bf16.msra.mxu0 %v912_v4  ;;  %v925_v20 = vld [vmem:[#allocation5 + $0x1e4] ss:$40 sps:$4 sm:$0xff]   ;;  %v927_v21 = vld [vmem:[#allocation5 + $0x1e0] ss:$40 sps:$4 sm:$0xff]   ;;  %v928_v24 = vld [vmem:[#allocation5 + $0x234] ss:$40 sps:$4 sm:$0xff]  }
  0x3e   :  { %593 = vmatprep.subr.bf16.mxu0 %v913_v5  ;;  %v951_v22 = vld [vmem:[#allocation5 + $0xf8] ss:$40 sps:$4 sm:$0xff]   ;;  %v955_v23 = vld [vmem:[#allocation5 + $0x14c] ss:$40 sps:$4 sm:$0xff]   ;;  %v957_v27 = vld [vmem:[#allocation5 + $0x148] ss:$40 sps:$4 sm:$0xff]  }
  0x3f   :  { %633 = vmatpush1.bf16.msra.mxu1 %v939_v13  ;;  %v930_v25 = vld [vmem:[#allocation5 + $0x230] ss:$40 sps:$4 sm:$0xff]   ;;  %v961_v28 = vld [vmem:[#allocation5 + $0x19c] ss:$40 sps:$4 sm:$0xff]   ;;  %v967_v33 = vld [vmem:[#allocation5 + $0x1ec] ss:$40 sps:$4 sm:$0xff]  }
  0x40   :  { %634 = vmatprep.subr.bf16.mxu1 %v943_v16  ;;  %v936_v29 = vld [vmem:[#allocation5 + $0x14] ss:$40 sps:$4 sm:$0xff]   ;;  %v934_v31 = vld [vmem:[#allocation5 + $0x10] ss:$40 sps:$4 sm:$0xff]   ;;  %v942_v34 = vld [vmem:[#allocation5 + $0x64] ss:$40 sps:$4 sm:$0xff]  }
  0x41   :  { %594 = vmatpush1.bf16.msra.mxu0 %v915_v6  ;;  %v963_v32 = vld [vmem:[#allocation5 + $0x198] ss:$40 sps:$4 sm:$0xff]   ;;  %v969_v36 = vld [vmem:[#allocation5 + $0x1e8] ss:$40 sps:$4 sm:$0xff]   ;;  %v973_v37 = vld [vmem:[#allocation5 + $0x23c] ss:$40 sps:$4 sm:$0xff]  }
  0x42   :  { %595 = vmatprep.subr.bf16.mxu0 %v916_v7  ;;  %v940_v35 = vld [vmem:[#allocation5 + $0x60] ss:$40 sps:$4 sm:$0xff]   ;;  %v948_v38 = vld [vmem:[#allocation5 + $0xb4] ss:$40 sps:$4 sm:$0xff]   ;;  %v946_v39 = vld [vmem:[#allocation5 + $0xb0] ss:$40 sps:$4 sm:$0xff]  }
  0x43   :  { %635 = vmatpush1.bf16.msra.mxu1 %v945_v18  ;;  %v975_v40 = vld [vmem:[#allocation5 + $0x238] ss:$40 sps:$4 sm:$0xff]   ;;  %v981_v41 = vld [vmem:[#allocation5 + $0x1c] ss:$40 sps:$4 sm:$0xff]   ;;  %v987_v45 = vld [vmem:[#allocation5 + $0x6c] ss:$40 sps:$4 sm:$0xff]  }
  0x44   :  { %636 = vmatprep.subr.bf16.mxu1 %v949_v19  ;;  %v954_v42 = vld [vmem:[#allocation5 + $0x104] ss:$40 sps:$4 sm:$0xff]   ;;  %v952_v43 = vld [vmem:[#allocation5 + $0x100] ss:$40 sps:$4 sm:$0xff]   ;;  %v960_v46 = vld [vmem:[#allocation5 + $0x154] ss:$40 sps:$4 sm:$0xff]   ;;  %v139_v19 = vlaneseq }
  0x45   :  { %596 = vmatpush1.bf16.msra.mxu0 %v918_v8  ;;  %v979_v44 = vld [vmem:[#allocation5 + $0x18] ss:$40 sps:$4 sm:$0xff]   ;;  %v985_v48 = vld [vmem:[#allocation5 + $0x68] ss:$40 sps:$4 sm:$0xff]   ;;  %v993_v49 = vld [vmem:[#allocation5 + $0xbc] ss:$40 sps:$4 sm:$0xff]  }
  0x46   :  { %597 = vmatprep.subr.bf16.mxu0 %v919_v11  ;;  %v958_v47 = vld [vmem:[#allocation5 + $0x150] ss:$40 sps:$4 sm:$0xff]   ;;  %v966_v50 = vld [vmem:[#allocation5 + $0x1a4] ss:$40 sps:$4 sm:$0xff]   ;;  %v964_v51 = vld [vmem:[#allocation5 + $0x1a0] ss:$40 sps:$4 sm:$0xff]  }
  0x47   :  { %637 = vmatpush1.bf16.msra.mxu1 %v951_v22  ;;  %v991_v52 = vld [vmem:[#allocation5 + $0xb8] ss:$40 sps:$4 sm:$0xff]   ;;  %v999_v53 = vld [vmem:[#allocation5 + $0x10c] ss:$40 sps:$4 sm:$0xff]   ;;  %v997_v55 = vld [vmem:[#allocation5 + $0x108] ss:$40 sps:$4 sm:$0xff]  }
  0x48   :  { %638 = vmatprep.subr.bf16.mxu1 %v955_v23  ;;  %v972_v54 = vld [vmem:[#allocation5 + $0x1f4] ss:$40 sps:$4 sm:$0xff]   ;;  %v970_v56 = vld [vmem:[#allocation5 + $0x1f0] ss:$40 sps:$4 sm:$0xff]   ;;  %v978_v58 = vld [vmem:[#allocation5 + $0x244] ss:$40 sps:$4 sm:$0xff]  }
  0x49   :  { %598 = vmatpush1.bf16.msra.mxu0 %v921_v14  ;;  %v1005_v57 = vld [vmem:[#allocation5 + $0x15c] ss:$40 sps:$4 sm:$0xff]   ;;  %v1003_v59 = vld [vmem:[#allocation5 + $0x158] ss:$40 sps:$4 sm:$0xff]   ;;  %v1011_v61 = vld [vmem:[#allocation5 + $0x1ac] ss:$40 sps:$4 sm:$0xff]  }
  0x4a   :  { %599 = vmatprep.subr.bf16.mxu0 %v922_v15  ;;  %v976_v60 = vld [vmem:[#allocation5 + $0x240] ss:$40 sps:$4 sm:$0xff]   ;;  %v984_v62 = vld [vmem:[#allocation5 + $0x24] ss:$40 sps:$4 sm:$0xff]   ;;  %v990_v3 = vld [vmem:[#allocation5 + $0x74] ss:$40 sps:$4 sm:$0xff]  }
  0x4b   :  { %639 = vmatpush1.bf16.msra.mxu1 %v957_v27  ;;  %v1009_v63 = vld [vmem:[#allocation5 + $0x1a8] ss:$40 sps:$4 sm:$0xff]   ;;  %v1017_v2 = vld [vmem:[#allocation5 + $0x1fc] ss:$40 sps:$4 sm:$0xff]   ;;  %v1015_v4 = vld [vmem:[#allocation5 + $0x1f8] ss:$40 sps:$4 sm:$0xff]  }
  0x4c   :  { %640 = vmatprep.subr.bf16.mxu1 %v961_v28  ;;  %v982_v1 = vld [vmem:[#allocation5 + $0x20] ss:$40 sps:$4 sm:$0xff]   ;;  %v988_v5 = vld [vmem:[#allocation5 + $0x70] ss:$40 sps:$4 sm:$0xff]   ;;  %v1023_v6 = vld [vmem:[#allocation5 + $0x24c] ss:$40 sps:$4 sm:$0xff]  }
  0x4d   :  { %600 = vmatpush1.bf16.msra.mxu0 %v924_v17  ;;  %v996_v7 = vld [vmem:[#allocation5 + $0xc4] ss:$40 sps:$4 sm:$0xff]   ;;  %v1021_v8 = vld [vmem:[#allocation5 + $0x248] ss:$40 sps:$4 sm:$0xff]   ;;  %v1002_v10 = vld [vmem:[#allocation5 + $0x114] ss:$40 sps:$4 sm:$0xff]  }
  0x4e   :  { %601 = vmatprep.subr.bf16.mxu0 %v925_v20  ;;  %v994_v9 = vld [vmem:[#allocation5 + $0xc0] ss:$40 sps:$4 sm:$0xff]   ;;  %v1000_v11 = vld [vmem:[#allocation5 + $0x110] ss:$40 sps:$4 sm:$0xff]   ;;  %v1008_v12 = vld [vmem:[#allocation5 + $0x164] ss:$40 sps:$4 sm:$0xff]  }
  0x4f   :  { %641 = vmatpush1.bf16.msra.mxu1 %v963_v32  ;;  %v1006_v13 = vld [vmem:[#allocation5 + $0x160] ss:$40 sps:$4 sm:$0xff]   ;;  %v1014_v14 = vld [vmem:[#allocation5 + $0x1b4] ss:$40 sps:$4 sm:$0xff]   ;;  %v1020_v15 = vld [vmem:[#allocation5 + $0x204] ss:$40 sps:$4 sm:$0xff]  }
  0x50   :  { %642 = vmatprep.subr.bf16.mxu1 %v967_v33  ;;  %v1018_v16 = vld [vmem:[#allocation5 + $0x200] ss:$40 sps:$4 sm:$0xff]   ;;  %v1026_v17 = vld [vmem:[#allocation5 + $0x254] ss:$40 sps:$4 sm:$0xff]   ;;  %v1024_v18 = vld [vmem:[#allocation5 + $0x250] ss:$40 sps:$4 sm:$0xff]  }
  0x51   :  { %602 = vmatpush1.bf16.msra.mxu0 %v927_v21  ;;  %v140_v20 = vshrl.u32 %v139_v19, 7  ;;  %v135_v22 = vld [vmem:[#allocation7] sm:$0xff]  ;;  %s1127_s2 = smov [#allocation8]  }
  0x52   :  { %603 = vmatprep.subr.bf16.mxu0 %v928_v24  ;;  %s810_s21 = sshll.u32 %s1127_s2, 4  ;;  %s811_s21 = int_to_ptr.vmem [resolvable:$true] %s810_s21 }
  0x53   :  { %643 = vmatpush1.bf16.msra.mxu1 %v969_v36  ;;  %v141_v21 = vsub.s32 0, %v140_v20  ;;  %v145_v23 = vsub.s32 1, %v140_v20  ;;  %v149_v33 = vsub.s32 2, %v140_v20  ;;  %s1093_s22 = scalar_lea.vmem %s811_s21, 1280  ;;  %p1098_p11 = scmp.lt.s32.totalorder %s811_s21, %s811_s21 }
  0x54   :  { %644 = vmatprep.subr.bf16.mxu1 %v973_v37  ;;  %p1094_p10 = scmp.ne.s32.totalorder %s811_s21, %s1093_s22  ;;  %p1099_p12 = scmp.lt.s32.totalorder %s1093_s22, %s1093_s22 }
  0x55   :  { %604 = vmatpush1.bf16.msra.mxu0 %v930_v25  ;;  %v142_v24 = vrot.slane %v135_v22, %v141_v21  ;;  %v146_v25 = vrot.slane %v135_v22, %v145_v23 }
  0x56   :  { %671 = vmatprep.subr.bf16.mxu0 %v936_v29  ;;  %p1100_p13 = por %p1099_p12, %p1098_p11 }
  0x57   :  { %645 = vmatpush1.bf16.msra.mxu1 %v975_v40 }
  0x58   :  { %622 = vmatmul.mubr.bf16.vlgmr.msra.gmra.mrb[0].mxu0 %v1186_v30  ;;  %712 = vmatprep.subr.bf16.mxu1 %v981_v41  ;;  %p1101_p0 = pnand %p1100_p13, %p1094_p10 }
  0x59   :  { %672 = vmatpush1.bf16.msra.mxu0 %v934_v31  ;;  %703 = vmatprep.mubr.bf16.mxu0 %v1126_v0 }
  0x5a   :  { %673 = vmatprep.subr.bf16.mxu0 %v942_v34  ;;  %663 = vmatmul.mubr.bf16.vlgmr.msra.gmra.mrb[0].mxu1 %v1186_v30  ;;  %v153_v34 = vsub.s32 3, %v140_v20 }
  0x5b   :  { %713 = vmatpush1.bf16.msra.mxu1 %v979_v44  ;;  %744 = vmatprep.mubr.bf16.mxu1 %v1126_v0 }
  0x5c   :  { %714 = vmatprep.subr.bf16.mxu1 %v987_v45  ;;  %v154_v36 = vrot.slane %v135_v22, %v153_v34 }
  0x5d   :  { %674 = vmatpush1.bf16.msra.mxu0 %v940_v35  ;;  %v150_v35 = vrot.slane %v135_v22, %v149_v33 }
  0x5e   :  { %675 = vmatprep.subr.bf16.mxu0 %v948_v38 }
  0x5f   :  { %715 = vmatpush1.bf16.msra.mxu1 %v985_v48 }
  0x60   :  { %716 = vmatprep.subr.bf16.mxu1 %v993_v49 }
  0x61   :  { %676 = vmatpush1.bf16.msra.mxu0 %v946_v39 }
  0x62   :  { %677 = vmatprep.subr.bf16.mxu0 %v954_v42  ;;  %v157_v42 = vsub.s32 4, %v140_v20 }
  0x63   :  { %717 = vmatpush1.bf16.msra.mxu1 %v991_v52  ;;  %v165_v52 = vsub.s32 6, %v140_v20 }
  0x64   :  { %718 = vmatprep.subr.bf16.mxu1 %v999_v53  ;;  %v158_v44 = vrot.slane %v135_v22, %v157_v42  ;;  %v169_v53 = vsub.s32 7, %v140_v20 }
  0x65   :  { %678 = vmatpush1.bf16.msra.mxu0 %v952_v43  ;;  %v161_v43 = vsub.s32 5, %v140_v20 }
  0x66   :  { %679 = vmatprep.subr.bf16.mxu0 %v960_v46 }
  0x67   :  { %719 = vmatpush1.bf16.msra.mxu1 %v997_v55  ;;  %v162_v45 = vrot.slane %v135_v22, %v161_v43  ;;  %v170_v55 = vrot.slane %v135_v22, %v169_v53 }
  0x68   :  { %720 = vmatprep.subr.bf16.mxu1 %v1005_v57 }
  0x69   :  { %680 = vmatpush1.bf16.msra.mxu0 %v958_v47 }
  0x6a   :  { %681 = vmatprep.subr.bf16.mxu0 %v966_v50 }
  0x6b   :  { %721 = vmatpush1.bf16.msra.mxu1 %v1003_v59 }
  0x6c   :  { %722 = vmatprep.subr.bf16.mxu1 %v1011_v61 }
  0x6d   :  { %682 = vmatpush1.bf16.msra.mxu0 %v964_v51 }
  0x6e   :  { %683 = vmatprep.subr.bf16.mxu0 %v972_v54  ;;  %v166_v54 = vrot.slane %v135_v22, %v165_v52 }
  0x6f   :  { %723 = vmatpush1.bf16.msra.mxu1 %v1009_v63 }
  0x70   :  { %724 = vmatprep.subr.bf16.mxu1 %v1017_v2 }
  0x71   :  { %684 = vmatpush1.bf16.msra.mxu0 %v970_v56 }
  0x72   :  { %685 = vmatprep.subr.bf16.mxu0 %v978_v58 }
  0x73   :  { %725 = vmatpush1.bf16.msra.mxu1 %v1015_v4 }
  0x74   :  { %726 = vmatprep.subr.bf16.mxu1 %v1023_v6 }
  0x75   :  { %686 = vmatpush1.bf16.msra.mxu0 %v976_v60 }
  0x76   :  { %753 = vmatprep.subr.bf16.mxu0 %v984_v62  ;;  %v136_v62 = vld [vmem:[#allocation7 + $0x8] sm:$0x3] }
  0x77   :  { %727 = vmatpush1.bf16.msra.mxu1 %v1021_v8  ;;  %v174_v63 = vrot.slane %v136_v62, %v141_v21 }
  0x78   :  { %704 = vmatmul.mubr.bf16.vlgmr.msra.gmra.mrb[4].mxu0 %v1186_v30 }
  0x79   :  { %754 = vmatpush1.bf16.msra.mxu0 %v982_v1  ;;  %785 = vmatprep.mubr.bf16.mxu0 %v1126_v0  ;;  %v1012_v0 = vld [vmem:[#allocation5 + $0x1b0] ss:$40 sps:$4 sm:$0xff]   ;;  %v178_v1 = vrot.slane %v136_v62, %v145_v23 }
  0x7a   :  { %755 = vmatprep.subr.bf16.mxu0 %v990_v3  ;;  %745 = vmatmul.mubr.bf16.vlgmr.msra.gmra.mrb[4].mxu1 %v1186_v30 }
  0x7d   :  { %756 = vmatpush1.bf16.msra.mxu0 %v988_v5 }
  0x7e   :  { %757 = vmatprep.subr.bf16.mxu0 %v996_v7 }
  0x81   :  { %758 = vmatpush1.bf16.msra.mxu0 %v994_v9 }
  0x82   :  { %759 = vmatprep.subr.bf16.mxu0 %v1002_v10 }
  0x85   :  { %760 = vmatpush1.bf16.msra.mxu0 %v1000_v11 }
  0x86   :  { %761 = vmatprep.subr.bf16.mxu0 %v1008_v12 }
  0x89   :  { %762 = vmatpush1.bf16.msra.mxu0 %v1006_v13 }
  0x8a   :  { %763 = vmatprep.subr.bf16.mxu0 %v1014_v14 }
  0x8d   :  { %764 = vmatpush1.bf16.msra.mxu0 %v1012_v0 }
  0x8e   :  { %765 = vmatprep.subr.bf16.mxu0 %v1020_v15 }
  0x91   :  { %766 = vmatpush1.bf16.msra.mxu0 %v1018_v16 }
  0x92   :  { %767 = vmatprep.subr.bf16.mxu0 %v1026_v17 }
  0x95   :  { %768 = vmatpush1.bf16.msra.mxu0 %v1024_v18 }
  0x98   :  { %786 = vmatmul.mubr.bf16.vlgmr.msra.gmra.mrb[8].mxu0 %v1186_v30 }
 0x12b   :  { %v623_v26 = vpop.f32.mrb[0].mxu0 }
 0x12c   :  { %v624_v27 = vadd.f32 %v623_v26, %v142_v24  ;;  %v625_v28 = vpop.f32.mrb[1].mxu0 }
 0x12d   :  { %v626_v29 = vadd.f32 %v625_v28, %v146_v25  ;;  %v627_v31 = vpop.f32.mrb[2].mxu0  ;;  %v664_v30 = vpop.f32.mrb[0].mxu1 }
 0x12e   :  { %794 = vst [vmem:[#allocation8] sm:$0xff] %v624_v27  ;;  %v628_v32 = vpop.f32.mrb[3].mxu0  ;;  %v665_v37 = vadd.f32 %v664_v30, %v150_v35  ;;  %v666_v38 = vpop.f32.mrb[1].mxu1 }
 0x12f   :  { %795 = vst [vmem:[#allocation8 + $0x8] sm:$0xff] %v626_v29  ;;  %v667_v39 = vadd.f32 %v666_v38, %v154_v36  ;;  %v668_v40 = vpop.f32.mrb[2].mxu1 }
 0x130   :  { %796 = vst [vmem:[#allocation8 + $0x10] sm:$0xff] %v665_v37  ;;  %v669_v41 = vpop.f32.mrb[3].mxu1 }
 0x131   :  { %797 = vst [vmem:[#allocation8 + $0x18] sm:$0xff] %v667_v39 }
 0x14b   :  { %v705_v46 = vpop.f32.mrb[4].mxu0 }
 0x14c   :  { %v706_v47 = vadd.f32 %v705_v46, %v158_v44  ;;  %v707_v48 = vpop.f32.mrb[5].mxu0 }
 0x14d   :  { %v708_v49 = vadd.f32 %v707_v48, %v162_v45  ;;  %v709_v50 = vpop.f32.mrb[6].mxu0  ;;  %v746_v56 = vpop.f32.mrb[4].mxu1 }
 0x14e   :  { %798 = vst [vmem:[#allocation8 + $0x20] sm:$0xff] %v706_v47  ;;  %v710_v51 = vpop.f32.mrb[7].mxu0  ;;  %v747_v57 = vadd.f32 %v746_v56, %v166_v54  ;;  %v748_v58 = vpop.f32.mrb[5].mxu1 }
 0x14f   :  { %799 = vst [vmem:[#allocation8 + $0x28] sm:$0xff] %v708_v49  ;;  %v749_v59 = vadd.f32 %v748_v58, %v170_v55  ;;  %v750_v60 = vpop.f32.mrb[6].mxu1 }
 0x150   :  { %800 = vst [vmem:[#allocation8 + $0x30] sm:$0xff] %v747_v57  ;;  %v751_v61 = vpop.f32.mrb[7].mxu1 }
 0x151   :  { %801 = vst [vmem:[#allocation8 + $0x38] sm:$0xff] %v749_v59 }
 0x16b   :  { %v787_v2 = vpop.f32.mrb[8].mxu0 }
 0x16c   :  { %v788_v3 = vadd.f32 %v787_v2, %v174_v63  ;;  %v789_v4 = vpop.f32.mrb[9].mxu0 }
 0x16d   :  { %v790_v5 = vadd.f32 %v789_v4, %v178_v1  ;;  %v791_v6 = vpop.f32.mrb[10].mxu0 }
 0x16e   :  { %802 = vst [vmem:[#allocation8 + $0x40] sm:$0xff] %v788_v3  ;;  %v792_v7 = vpop.f32.mrb[11].mxu0 }
 0x16f   :  { %803 = vst [vmem:[#allocation8 + $0x48] sm:$0xff] %v790_v5 }
 0x170   :  { %1104 = shalt.err (!%p1101_p0)
}
 0x171   :  { %s1105_s25 = scalar_lea.hbm %s1211_s3, 1280 }
 0x172   :  { %p1106_p1 = scmp.ne.s32.totalorder %s1211_s3, %s1105_s25  ;;  %p1109_p2 = scmp.lt.u32.totalorder %s1105_s25, %s1211_s3 }
 0x174   :  { %p1111_p3 = pnand %p1109_p2, %p1106_p1 }
 0x176   :  { %1114 = shalt.err (!%p1111_p3)
}
 0x177   :  { %813 = dma.vmem_to_hbm [thread:$0]  %s811_s21, 1280, %s1211_s3, [#allocation4]  }
 0x178   :  { %1119 = dma.done.wait [#allocation4], 1280  }
 0x179   :  { %1120 = vsyncadd [#allocation4], 4294966016 }
 0x17a   :  { %817 = vsyncpa [#allocation3], 1 }
 0x17b   :  { %818 = vsyncpa [#allocation6], 1 }
 0x17c   :  { %819 = vsyncpa [#allocation4], 1 }

</bundles_post_ra>
